<compile_context>
chip_gen: v7x
topology: tpu7x:2x2x1
jax: 0.10.0
libtpu: 0.0.40
codegen_flags: <defaults>
</compile_context>

<pallas_src>
import jax
import jax.numpy as jnp
from jax.experimental import pallas as pl
from jax.experimental.pallas import tpu as pltpu


def attention_kernel(q_ref, c_ref, w_in_t_ref, wm_t_ref, wq_t_ref, out_ref, attw_ref):
    # q_ref:      (Bb, L, D) bf16     c_ref: (Bb, S, D) bf16
    # w_in_t_ref: (D, D) bf16         wm_t_ref / wq_t_ref: (D, D) bf16 (pre-transposed halves of w_out)
    # out_ref:    (Bb, L, D) f32      attw_ref: (Bb, L, S) f32
    Bb, L, D = q_ref.shape

    # Fold batch into the matmul M dimension (layout no-op when L % 8 == 0).
    q2 = q_ref[...].reshape(Bb * L, D)             # (Bb*L, D) bf16
    c = c_ref[...]                                 # (Bb, S, D) bf16
    w_in_t = w_in_t_ref[...]
    wm_t = wm_t_ref[...]
    wq_t = wq_t_ref[...]

    # linear_in over all Bb*L rows at once: query @ W_in.T == q2 @ w_in_t  (bf16 x bf16 -> f32 acc)
    qp_f32 = jnp.dot(q2, w_in_t, preferred_element_type=jnp.float32)     # (Bb*L, D) f32
    qp_b = qp_f32.astype(jnp.bfloat16)                                   # reused twice below
    qp3 = qp_b.reshape(Bb, L, D)

    # attention_scores = bmm(query, context^T), f32 accumulation
    scores = jnp.einsum("bld,bsd->bls", qp3, c,
                        preferred_element_type=jnp.float32)              # (Bb, L, S) f32

    # softmax over S, kept in f32
    m = jnp.max(scores, axis=-1, keepdims=True)
    e = jnp.exp(scores - m)
    denom = jnp.sum(e, axis=-1, keepdims=True)
    inv = pl.reciprocal(denom, approx=True)        # EUP slot (cheap)
    inv = inv * (2.0 - denom * inv)                # one Newton step -> full f32 accuracy
    attw = e * inv                                 # (Bb, L, S) f32

    # mix = bmm(weights, context)  (probabilities cast to bf16 for the MXU, f32 acc)
    mix = jnp.einsum("bls,bsd->bld", attw.astype(jnp.bfloat16), c,
                     preferred_element_type=jnp.float32)                 # (Bb, L, D) f32

    # linear_out on concat([mix, qp]) == mix @ Wm.T + qp @ Wq.T  (exact split, hoisted to wrapper)
    mix_b = mix.reshape(Bb * L, D).astype(jnp.bfloat16)
    out2 = jnp.dot(mix_b, wm_t, preferred_element_type=jnp.float32) \
         + jnp.dot(qp_b, wq_t, preferred_element_type=jnp.float32)       # (Bb*L, D) f32

    out_ref[...] = jnp.tanh(out2).reshape(Bb, L, D).astype(out_ref.dtype)
    attw_ref[...] = attw.astype(attw_ref.dtype)


def _block_vmem_bytes(bb, L, S, D):
    """Rough per-block VMEM estimate: double-buffered I/O blocks + weights + live intermediates."""
    bf16, f32 = 2, 4
    rows = bb * L
    io = 2 * (bb * L * D * bf16 + bb * S * D * bf16       # q, c input blocks (x2 buffers)
              + bb * L * D * f32 + bb * L * S * f32)      # out, attw output blocks (x2 buffers)
    weights = 2 * 3 * D * D * bf16                        # three weight tiles (double-buffered)
    live = f32 * (2 * rows * D + 3 * bb * L * S) + bf16 * (3 * rows * D)   # qp, mix, scores/e/attw
    return io + weights + live


def _choose_batch_block(B, L, S, D, *, row_target=256, vmem_budget=20 * 1024 * 1024):
    """Pick Bb (batch rows per grid step) so that:
       - the block fits a conservative VMEM budget (safe on v7x's 64 MiB VMEM),
       - the grid has >= 2 steps when B allows (v7x has 2 TensorCores on the parallel axis),
       - Bb*L reaches ~256 rows of M when possible (fills the v6e/v7x 256-wide MXU).
       Falls back to Bb=1 (never the whole batch) if nothing else fits."""
    divisors = [d for d in range(1, B + 1) if B % d == 0]
    fits = [d for d in divisors if _block_vmem_bytes(d, L, S, D) <= vmem_budget] or [1]
    multi = [d for d in fits if B // d >= 2]               # keep both TCs busy on v7x
    pool = multi if multi else fits
    big_enough = [d for d in pool if d * L >= row_target]
    bb = min(big_enough) if big_enough else max(pool)
    return bb, B // bb


def attention_forward(query, context, w_in, w_out):
    B, L, D = query.shape
    S = context.shape[1]

    # --- layout / precision plumbing hoisted out of the kernel (done once, in XLA) ---------
    mxu = jnp.bfloat16
    q = query.astype(mxu)                    # (B, L, D)
    c = context.astype(mxu)                  # (B, S, D)
    w_in_t = w_in.T.astype(mxu)              # (D, D):  qp = q @ w_in_t
    wm_t = w_out[:, :D].T.astype(mxu)        # (D, D):  mix contribution of linear_out
    wq_t = w_out[:, D:].T.astype(mxu)        # (D, D):  qp  contribution of linear_out

    Bb, nb = _choose_batch_block(B, L, S, D)

    grid_spec = pltpu.PrefetchScalarGridSpec(
        num_scalar_prefetch=0,
        grid=(nb,),
        in_specs=[
            pl.BlockSpec((Bb, L, D), lambda b: (b, 0, 0)),
            pl.BlockSpec((Bb, S, D), lambda b: (b, 0, 0)),
            pl.BlockSpec((D, D), lambda b: (0, 0)),
            pl.BlockSpec((D, D), lambda b: (0, 0)),
            pl.BlockSpec((D, D), lambda b: (0, 0)),
        ],
        out_specs=[
            pl.BlockSpec((Bb, L, D), lambda b: (b, 0, 0)),
            pl.BlockSpec((Bb, L, S), lambda b: (b, 0, 0)),
        ],
    )

    # Advisory cost estimate (4 matmuls + softmax/tanh transcendentals).
    flops = 2 * B * L * D * D + 2 * B * L * S * D + 2 * B * L * S * D + 2 * B * L * (2 * D) * D
    transcendentals = B * L * S + B * L * D + B * L                    # exp + tanh + reciprocal
    bytes_accessed = 2 * (B * L * D + B * S * D + 3 * D * D) + 4 * (B * L * D + B * L * S)
    cost = pl.CostEstimate(flops=flops, transcendentals=transcendentals,
                           bytes_accessed=bytes_accessed)

    out, attw = pl.pallas_call(
        attention_kernel,
        out_shape=(
            jax.ShapeDtypeStruct((B, L, D), jnp.float32),
            jax.ShapeDtypeStruct((B, L, S), jnp.float32),
        ),
        grid_spec=grid_spec,
        compiler_params=pltpu.CompilerParams(
            dimension_semantics=("parallel",),
            vmem_limit_bytes=32 * 1024 * 1024,
        ),
        cost_estimate=cost,
    )(q, c, w_in_t, wm_t, wq_t)
    return out, attw


def attention_reference(query, context, w_in, w_out):
    """Pure-JAX f32 reference mirroring the PyTorch forward exactly."""
    qp = jnp.einsum("bld,ed->ble", query, w_in)                  # linear_in
    scores = jnp.einsum("bld,bsd->bls", qp, context)             # bmm
    attw = jax.nn.softmax(scores, axis=-1)
    mix = jnp.einsum("bls,bsd->bld", attw, context)              # bmm
    combined = jnp.concatenate([mix, qp], axis=-1)               # (B, L, 2D)
    out = jnp.tanh(jnp.einsum("blc,dc->bld", combined, w_out))   # linear_out + tanh
    return out, attw


def attention_reference_matched(query, context, w_in, w_out):
    """Reference with the same bf16-operand / f32-accumulate precision as the kernel."""
    bf = jnp.bfloat16
    q = query.astype(bf)
    c = context.astype(bf)
    wi = w_in.astype(bf)
    wo = w_out.astype(bf)
    qp = jnp.einsum("bld,ed->ble", q, wi, preferred_element_type=jnp.float32)
    qp_b = qp.astype(bf)
    scores = jnp.einsum("bld,bsd->bls", qp_b, c, preferred_element_type=jnp.float32)
    attw = jax.nn.softmax(scores, axis=-1)
    mix = jnp.einsum("bls,bsd->bld", attw.astype(bf), c, preferred_element_type=jnp.float32)
    combined = jnp.concatenate([mix.astype(bf), qp_b], axis=-1)
    out = jnp.tanh(jnp.einsum("blc,dc->bld", combined, wo, preferred_element_type=jnp.float32))
    return out, attw


if __name__ == "__main__":
    B, L, S, D = 2, 8, 8, 32   # batch, output_len, query_len, dimensions

    key = jax.random.PRNGKey(0)
    kq, kc, kwi, kwo = jax.random.split(key, 4)

    query = jax.random.normal(kq, (B, L, D), dtype=jnp.float32)
    context = jax.random.normal(kc, (B, S, D), dtype=jnp.float32)
    # Deterministic synthetic weights (PyTorch nn.Linear convention: (out_features, in_features)).
    w_in = jax.random.uniform(kwi, (D, D), jnp.float32, -1.0, 1.0) / jnp.sqrt(D)
    w_out = jax.random.uniform(kwo, (D, 2 * D), jnp.float32, -1.0, 1.0) / jnp.sqrt(2 * D)

    out, attw = attention_forward(query, context, w_in, w_out)
    out, attw = jax.block_until_ready((out, attw))

    # Tight check against a reference with identical bf16-operand / f32-accumulate precision.
    mref_out, mref_attw = attention_reference_matched(query, context, w_in, w_out)
    assert jnp.allclose(out, mref_out, atol=1e-3, rtol=1e-3), "output mismatch (matched precision)"
    assert jnp.allclose(attw, mref_attw, atol=1e-3, rtol=1e-3), "weights mismatch (matched precision)"

    # Relaxed check against the exact PyTorch-semantics f32 reference (bf16 operand rounding).
    ref_out, ref_attw = attention_reference(query, context, w_in, w_out)
    assert jnp.allclose(out, ref_out, atol=5e-2, rtol=5e-2), "output mismatch (f32 reference)"
    assert jnp.allclose(attw, ref_attw, atol=5e-2, rtol=5e-2), "weights mismatch (f32 reference)"

    print("KERNEL_OK")
</pallas_src>

<mosaic_0001>
module attributes {stable_mosaic.version = 11 : i64} {
  func.func @attention_kernel(%arg0: i32, %arg1: memref<1x8x32xbf16, #tpu.memory_space<vmem>>, %arg2: memref<1x8x32xbf16, #tpu.memory_space<vmem>>, %arg3: memref<32x32xbf16, #tpu.memory_space<vmem>>, %arg4: memref<32x32xbf16, #tpu.memory_space<vmem>>, %arg5: memref<32x32xbf16, #tpu.memory_space<vmem>>, %arg6: memref<1x8x32xf32, #tpu.memory_space<vmem>>, %arg7: memref<1x8x8xf32, #tpu.memory_space<vmem>>) attributes {dimension_semantics = [#tpu.dimension_semantics<parallel>], iteration_bounds = array<i64: 2>, scalar_prefetch = 0 : i64, scratch_operands = 0 : i64, tpu.core_type = #tpu.core_type<tc>, window_params = [{transform_indices = @transform_0, window_bounds = array<i64: 1, 8, 32>}, {transform_indices = @transform_1, window_bounds = array<i64: 1, 8, 32>}, {pipeline_mode = #tpu.pipeline_mode<synchronous>, transform_indices = @transform_2, window_bounds = array<i64: 32, 32>}, {pipeline_mode = #tpu.pipeline_mode<synchronous>, transform_indices = @transform_3, window_bounds = array<i64: 32, 32>}, {pipeline_mode = #tpu.pipeline_mode<synchronous>, transform_indices = @transform_4, window_bounds = array<i64: 32, 32>}, {transform_indices = @transform_5, window_bounds = array<i64: 1, 8, 32>}, {transform_indices = @transform_6, window_bounds = array<i64: 1, 8, 8>}]} {
    %c0 = arith.constant 0 : index
    %c0_0 = arith.constant 0 : index
    %c0_1 = arith.constant 0 : index
    %0 = vector.load %arg1[%c0, %c0_0, %c0_1] : memref<1x8x32xbf16, #tpu.memory_space<vmem>>, vector<1x8x32xbf16>
    %1 = vector.shape_cast %0 : vector<1x8x32xbf16> to vector<8x32xbf16>
    %c0_2 = arith.constant 0 : index
    %c0_3 = arith.constant 0 : index
    %c0_4 = arith.constant 0 : index
    %2 = vector.load %arg2[%c0_2, %c0_3, %c0_4] : memref<1x8x32xbf16, #tpu.memory_space<vmem>>, vector<1x8x32xbf16>
    %c0_5 = arith.constant 0 : index
    %c0_6 = arith.constant 0 : index
    %3 = vector.load %arg3[%c0_5, %c0_6] : memref<32x32xbf16, #tpu.memory_space<vmem>>, vector<32x32xbf16>
    %c0_7 = arith.constant 0 : index
    %c0_8 = arith.constant 0 : index
    %4 = vector.load %arg4[%c0_7, %c0_8] : memref<32x32xbf16, #tpu.memory_space<vmem>>, vector<32x32xbf16>
    %c0_9 = arith.constant 0 : index
    %c0_10 = arith.constant 0 : index
    %5 = vector.load %arg5[%c0_9, %c0_10] : memref<32x32xbf16, #tpu.memory_space<vmem>>, vector<32x32xbf16>
    %cst = arith.constant dense<0.000000e+00> : vector<8x32xf32>
    %6 = tpu.matmul %1, %3, %cst {dimension_numbers = #tpu.dot_dimension_numbers<[1], [0], [0], [1], [0, 0, 1, 1], [], []>} : vector<8x32xbf16>, vector<32x32xbf16>, vector<8x32xf32> -> vector<8x32xf32>
    %7 = arith.truncf %6 : vector<8x32xf32> to vector<8x32xbf16>
    %8 = vector.shape_cast %7 : vector<8x32xbf16> to vector<1x8x32xbf16>
    "tpu.trace_start"() <{level = 10 : i32, message = "bld,bsd->bls"}> : () -> ()
    %cst_11 = arith.constant dense<0.000000e+00> : vector<1x8x8xf32>
    %9 = tpu.matmul %8, %2, %cst_11 {dimension_numbers = #tpu.dot_dimension_numbers<[2], [2], [1], [1], [0, 0, 0, 1, 1, 1], [0], [0]>} : vector<1x8x32xbf16>, vector<1x8x32xbf16>, vector<1x8x8xf32> -> vector<1x8x8xf32>
    "tpu.trace_stop"() : () -> ()
    %cst_12 = arith.constant dense<0xFF800000> : vector<1x8xf32>
    %10 = vector.multi_reduction <maximumf>, %9, %cst_12 [2] : vector<1x8x8xf32> to vector<1x8xf32>
    %11 = vector.shape_cast %10 : vector<1x8xf32> to vector<1x8x1xf32>
    %12 = vector.broadcast %11 : vector<1x8x1xf32> to vector<1x8x8xf32>
    %13 = arith.subf %9, %12 : vector<1x8x8xf32>
    %14 = math.exp %13 : vector<1x8x8xf32>
    %cst_13 = arith.constant dense<0.000000e+00> : vector<1x8xf32>
    %15 = vector.multi_reduction <add>, %14, %cst_13 [2] : vector<1x8x8xf32> to vector<1x8xf32>
    %16 = vector.shape_cast %15 : vector<1x8xf32> to vector<1x8x1xf32>
    %17 = tpu.reciprocal %16 {approx = true} : vector<1x8x1xf32> -> vector<1x8x1xf32>
    %18 = arith.mulf %16, %17 : vector<1x8x1xf32>
    %cst_14 = arith.constant 2.000000e+00 : f32
    %19 = vector.broadcast %cst_14 : f32 to vector<1x8x1xf32>
    %20 = arith.subf %19, %18 : vector<1x8x1xf32>
    %21 = arith.mulf %17, %20 : vector<1x8x1xf32>
    %22 = vector.broadcast %21 : vector<1x8x1xf32> to vector<1x8x8xf32>
    %23 = arith.mulf %14, %22 : vector<1x8x8xf32>
    %24 = arith.truncf %23 : vector<1x8x8xf32> to vector<1x8x8xbf16>
    "tpu.trace_start"() <{level = 10 : i32, message = "bls,bsd->bld"}> : () -> ()
    %cst_15 = arith.constant dense<0.000000e+00> : vector<1x8x32xf32>
    %25 = tpu.matmul %24, %2, %cst_15 {dimension_numbers = #tpu.dot_dimension_numbers<[2], [1], [1], [2], [0, 0, 0, 1, 1, 2], [0], [0]>} : vector<1x8x8xbf16>, vector<1x8x32xbf16>, vector<1x8x32xf32> -> vector<1x8x32xf32>
    "tpu.trace_stop"() : () -> ()
    %26 = vector.shape_cast %25 : vector<1x8x32xf32> to vector<8x32xf32>
    %27 = arith.truncf %26 : vector<8x32xf32> to vector<8x32xbf16>
    %cst_16 = arith.constant dense<0.000000e+00> : vector<8x32xf32>
    %28 = tpu.matmul %27, %4, %cst_16 {dimension_numbers = #tpu.dot_dimension_numbers<[1], [0], [0], [1], [0, 0, 1, 1], [], []>} : vector<8x32xbf16>, vector<32x32xbf16>, vector<8x32xf32> -> vector<8x32xf32>
    %cst_17 = arith.constant dense<0.000000e+00> : vector<8x32xf32>
    %29 = tpu.matmul %7, %5, %cst_17 {dimension_numbers = #tpu.dot_dimension_numbers<[1], [0], [0], [1], [0, 0, 1, 1], [], []>} : vector<8x32xbf16>, vector<32x32xbf16>, vector<8x32xf32> -> vector<8x32xf32>
    %30 = arith.addf %28, %29 : vector<8x32xf32>
    %31 = math.tanh %30 : vector<8x32xf32>
    %32 = vector.shape_cast %31 : vector<8x32xf32> to vector<1x8x32xf32>
    %c0_18 = arith.constant 0 : index
    %c0_19 = arith.constant 0 : index
    %c0_20 = arith.constant 0 : index
    %33 = vector.load %arg6[%c0_18, %c0_19, %c0_20] : memref<1x8x32xf32, #tpu.memory_space<vmem>>, vector<1x8x32xf32>
    tpu.vector_store %arg6[%c0_18, %c0_19, %c0_20], %32 {strides = array<i32>} : memref<1x8x32xf32, #tpu.memory_space<vmem>>, vector<1x8x32xf32>,
    %c0_21 = arith.constant 0 : index
    %c0_22 = arith.constant 0 : index
    %c0_23 = arith.constant 0 : index
    %34 = vector.load %arg7[%c0_21, %c0_22, %c0_23] : memref<1x8x8xf32, #tpu.memory_space<vmem>>, vector<1x8x8xf32>
    tpu.vector_store %arg7[%c0_21, %c0_22, %c0_23], %23 {strides = array<i32>} : memref<1x8x8xf32, #tpu.memory_space<vmem>>, vector<1x8x8xf32>,
    return
  }
  func.func @transform_0(%arg0: i32) -> (i32, i32, i32) {
    %c0_i32 = arith.constant 0 : i32
    %c0_i32_0 = arith.constant 0 : i32
    %c0_i32_1 = arith.constant 0 : i32
    return %arg0, %c0_i32, %c0_i32_0 : i32, i32, i32
  }
  func.func @transform_1(%arg0: i32) -> (i32, i32, i32) {
    %c0_i32 = arith.constant 0 : i32
    %c0_i32_0 = arith.constant 0 : i32
    %c0_i32_1 = arith.constant 0 : i32
    return %arg0, %c0_i32, %c0_i32_0 : i32, i32, i32
  }
  func.func @transform_2(%arg0: i32) -> (i32, i32) {
    %c0_i32 = arith.constant 0 : i32
    %c0_i32_0 = arith.constant 0 : i32
    %c0_i32_1 = arith.constant 0 : i32
    return %c0_i32, %c0_i32_0 : i32, i32
  }
  func.func @transform_3(%arg0: i32) -> (i32, i32) {
    %c0_i32 = arith.constant 0 : i32
    %c0_i32_0 = arith.constant 0 : i32
    %c0_i32_1 = arith.constant 0 : i32
    return %c0_i32, %c0_i32_0 : i32, i32
  }
  func.func @transform_4(%arg0: i32) -> (i32, i32) {
    %c0_i32 = arith.constant 0 : i32
    %c0_i32_0 = arith.constant 0 : i32
    %c0_i32_1 = arith.constant 0 : i32
    return %c0_i32, %c0_i32_0 : i32, i32
  }
  func.func @transform_5(%arg0: i32) -> (i32, i32, i32) {
    %c0_i32 = arith.constant 0 : i32
    %c0_i32_0 = arith.constant 0 : i32
    %c0_i32_1 = arith.constant 0 : i32
    return %arg0, %c0_i32, %c0_i32_0 : i32, i32, i32
  }
  func.func @transform_6(%arg0: i32) -> (i32, i32, i32) {
    %c0_i32 = arith.constant 0 : i32
    %c0_i32_0 = arith.constant 0 : i32
    %c0_i32_1 = arith.constant 0 : i32
    return %arg0, %c0_i32, %c0_i32_0 : i32, i32, i32
  }
}

</mosaic_0001>

<bundles_post_ra>
// kernel: tpu_custom_call.1
= control target key start
LH: loop header
LB: loop body
LE: loop exit
PB: predicated region body
PF: predicated region fallthrough
CT: control target
= control target key end

     0   :  { %s1671_s0 = inlined_call_operand.hbm [shape: bf16[2,8,32], index: 0, kind: input, shape index: {}]   ;;  %s1672_s1 = inlined_call_operand.hbm [shape: bf16[2,8,32], index: 1, kind: input, shape index: {}]   ;;  %s1673_s2 = inlined_call_operand.hbm [shape: bf16[32,32], index: 2, kind: input, shape index: {}]   ;;  %s1674_s3 = inlined_call_operand.hbm [shape: bf16[32,32], index: 3, kind: input, shape index: {}]   ;;  %s1675_s4 = inlined_call_operand.hbm [shape: bf16[32,32], index: 4, kind: input, shape index: {}]   ;;  %s1676_s5 = inlined_call_operand.hbm [shape: f32[2,8,32], index: 5, kind: output, shape index: {0}]   ;;  %s1677_s6 = inlined_call_operand.hbm [shape: f32[2,8,8], index: 6, kind: output, shape index: {1}]  }
   0x1   :  { %1682 = sst [smem:[#allocation20_spill]] %s1673_s2 }
   0x2   :  { %1683 = sst [smem:[#allocation21_spill]] %s1674_s3 }
   0x3   :  { %1684 = sst [smem:[#allocation22_spill]] %s1675_s4 }
   0x4   :  { %12 = vsyncpa [#allocation3], 0 }
   0x5   :  { %14 = vsyncpa [#allocation3 + $0x1], 0 }
   0x6   :  { %15 = vsyncpa [#allocation6], 0 }
   0x7   :  { %17 = vsyncpa [#allocation6 + $0x1], 0 }
   0x8   :  { %18 = vsyncpa [#allocation9], 0 }
   0x9   :  { %19 = vsyncpa [#allocation4], 0 }
   0xa   :  { %21 = vsyncpa [#allocation4 + $0x1], 0 }
   0xb   :  { %22 = vsyncpa [#allocation13], 0 }
   0xc   :  { %24 = vsyncpa [#allocation13 + $0x1], 0  ;;  %s1327_s21 = smov 0   ;;  %s1329_s22 = smov 0  }
   0xd   :  { %s1331_s23 = smov 0   ;;  %s1333_s24 = smov 0  }
   0xe LB: > { %s1348_s25 = sadd.s32 4294967295, %s1279_s24   ;;  %s834_s26 = sadd.s32 4294967294, %s1279_s24   ;;  %s1279_s24 = sphi %s1333_s24, %s1708_s24   ;;  %s1275_s23 = sphi %s1331_s23, %s1707_s23   ;;  %s1271_s22 = sphi %s1329_s22, %s1706_s22   ;;  %s1267_s21 = sphi %s1327_s21, %s1705_s21  }
   0xf   : > { %p50_p0 = scmp.ne.s32.totalorder %s1271_s22, %s1267_s21  ;;  %p1678_p1 = scmp.eq.s32.totalorder %s1348_s25, 0 }
  0x10   : > { %p169_p3 = scmp.eq.s32.totalorder %s834_s26, 1  ;;  %p835_p5 = scmp.ge.s32.totalorder %s1279_s24, 1 }
  0x11   : > { %p1357_p4 = por %p1678_p1, %p50_p0  ;;  %p202_p7 = scmp.lt.s32.totalorder %s1279_s24, 3 }
  0x12   : > { %p1362_p6 = por %p169_p3, %p50_p0  ;;  %s1281_s30 = smov [#allocation7]  }
  0x13   : > { %s1685_s27 = scalar_select %p1357_p4, 1, 0 }
  0x14   : > { %s1686_s28 = scalar_select %p1362_p6, 1, 0 }
  0x15   : > { %p1367_p8 = pnand %p835_p5, %p202_p7  ;;  %s214_s7 = sshll.u32 %s1281_s30, 4  ;;  %s1371_s7 = int_to_ptr.vmem [resolvable:$true] %s214_s7 }
  0x16   : > { %s1282_s9 = smov [#allocation8]   ;;  %s1283_s11 = smov [#allocation10]  }
  0x17   : > { %s1687_s29 = scalar_select %p1367_p8, 1, 0 }
  0x18   : > { %p942_p9 = pneg %p1367_p8  ;;  %s227_s10 = sshll.u32 %s1282_s9, 4  ;;  %s1382_s10 = int_to_ptr.vmem [resolvable:$true] %s227_s10 }
  0x19   : > { %s1384_s12 = sshll.u32 %s1283_s11, 4  ;;  %s1689_s2 = sld [smem:[#allocation20_spill]]  ;;  %s241_s12 = int_to_ptr.vmem [resolvable:$true] %s1384_s12 }
  0x1a   : > { %p1378_p11 = pnand %p942_p9, %p1678_p1 }
  0x1c   : > { %p1394_p13 = pneg %p1378_p11 }
  0x1f   : > { %s1025_s15 = scalar_lea.hbm %s1689_s2, 256 }
  0x20   : > { %p1026_p12 = scmp.ne.s32.totalorder %s1689_s2, %s1025_s15  ;;  %p1032_p5 = scmp.lt.u32.totalorder %s1025_s15, %s1689_s2 }
  0x22   : > { %p1028_p0 = pnand %p1394_p13, %p1026_p12 }
  0x24   : > { %p1029_p3 = pneg %p1028_p0 }
  0x26   : > { %p1034_p7 = pnand %p1032_p5, %p1029_p3 }
  0x28   : > { %1037 = shalt.err (!%p1034_p7)
}
  0x29   : > { %s1038_s26 = scalar_lea.vmem %s1371_s7, 256  ;;  %p1046_p2 = scmp.lt.s32.totalorder %s1371_s7, %s1371_s7 }
  0x2a   : > { %p1039_p9 = scmp.ne.s32.totalorder %s1371_s7, %s1038_s26  ;;  %p1047_p6 = scmp.lt.s32.totalorder %s1038_s26, %s1038_s26 }
  0x2c   : > { %p1041_p10 = pnand %p1039_p9, %p1394_p13  ;;  %p1048_p12 = por %p1047_p6, %p1046_p2 }
  0x2e   : > { %p1042_p1 = pneg %p1041_p10 }
  0x30   : > { %p1049_p0 = pnand %p1048_p12, %p1042_p1 }
  0x32   : > { %1052 = shalt.err (!%p1049_p0)
}
  0x33   : > { %s1284_s30 = smov 64   ;;  %s1285_s9 = smov 4  }
  0x34   : > { %945 = dma.hbm_to_vmem [thread:$0]  (!%p1378_p11), %s1689_s2, 256, %s1371_s7, [#allocation6], %s1284_s30, %s1284_s30, %s1285_s9  }
  0x35   : > { %s1691_s3 = sld [smem:[#allocation21_spill]] }
  0x3b   : > { %s1053_s16 = scalar_lea.hbm %s1691_s3, 256 }
  0x3c   : > { %p1054_p1 = scmp.ne.s32.totalorder %s1691_s3, %s1053_s16  ;;  %p1060_p10 = scmp.lt.u32.totalorder %s1053_s16, %s1691_s3 }
  0x3e   : > { %p1056_p2 = pnand %p1054_p1, %p1394_p13 }
  0x40   : > { %p1057_p6 = pneg %p1056_p2 }
  0x42   : > { %p1062_p3 = pnand %p1060_p10, %p1057_p6 }
  0x44   : > { %1065 = shalt.err (!%p1062_p3)
}
  0x45   : > { %s1066_s7 = scalar_lea.vmem %s1382_s10, 256  ;;  %p1074_p12 = scmp.lt.s32.totalorder %s1382_s10, %s1382_s10 }
  0x46   : > { %p1067_p5 = scmp.ne.s32.totalorder %s1382_s10, %s1066_s7  ;;  %p1075_p0 = scmp.lt.s32.totalorder %s1066_s7, %s1066_s7 }
  0x48   : > { %p1069_p7 = pnand %p1067_p5, %p1394_p13  ;;  %p1076_p1 = por %p1075_p0, %p1074_p12 }
  0x4a   : > { %p1070_p9 = pneg %p1069_p7 }
  0x4c   : > { %p1077_p2 = pnand %p1076_p1, %p1070_p9 }
  0x4e   : > { %1080 = shalt.err (!%p1077_p2)
}
  0x4f   : > { %948 = dma.hbm_to_vmem [thread:$0]  (!%p1378_p11), %s1691_s3, 256, %s1382_s10, [#allocation9], %s1284_s30, %s1284_s30, %s1285_s9  }
  0x50   : > { %s1692_s4 = sld [smem:[#allocation22_spill]] }
  0x56   : > { %s1081_s16 = scalar_lea.hbm %s1692_s4, 256 }
  0x57   : > { %p1082_p6 = scmp.ne.s32.totalorder %s1692_s4, %s1081_s16  ;;  %p1088_p5 = scmp.lt.u32.totalorder %s1081_s16, %s1692_s4 }
  0x59   : > { %p1084_p10 = pnand %p1082_p6, %p1394_p13 }
  0x5b   : > { %p1085_p3 = pneg %p1084_p10 }
  0x5d   : > { %p1090_p7 = pnand %p1088_p5, %p1085_p3 }
  0x5f   : > { %1093 = shalt.err (!%p1090_p7)
}
  0x60   : > { %s1094_s7 = scalar_lea.vmem %s241_s12, 256  ;;  %p1102_p1 = scmp.lt.s32.totalorder %s241_s12, %s241_s12 }
  0x61   : > { %p1095_p9 = scmp.ne.s32.totalorder %s241_s12, %s1094_s7  ;;  %p1103_p2 = scmp.lt.s32.totalorder %s1094_s7, %s1094_s7 }
  0x63   : > { %p1097_p12 = pnand %p1095_p9, %p1394_p13  ;;  %p1104_p4 = por %p1103_p2, %p1102_p1 }
  0x65   : > { %p1098_p0 = pneg %p1097_p12 }
  0x67   : > { %p1105_p8 = pnand %p1104_p4, %p1098_p0 }
  0x69   : > { %1108 = shalt.err (!%p1105_p8)
}
  0x6a   : > { %951 = dma.hbm_to_vmem [thread:$0]  (!%p1378_p11), %s1692_s4, 256, %s241_s12, [#allocation9], %s1284_s30, %s1284_s30, %s1285_s9  }
  0x6b   : > { %s1467_s18 = sadd.s32 1, %s1279_s24   ;;  %s37_s13 = sadd.s32 1, %s1275_s23 }
  0x6c   : > { %s34_s8 = ssub.s32 %s1279_s24, %s1467_s18  ;;  %p44_p8 = scmp.ne.s32.totalorder %s1275_s23, %s1271_s22 }
  0x6d   : > { %p35_p4 = scmp.eq.s32.totalorder %s34_s8, 0  ;;  %p45_p13 = scmp.eq.s32.totalorder %s1279_s24, 0 }
  0x6e   : > { %p969_p6 = scmp.lt.s32.totalorder %s1279_s24, 2  ;;  %p1693_p3 = scmp.eq.s32.totalorder %s1348_s25, 1 }
  0x6f   : > { %s1477_s14 = scalar_select %p35_p4, %s1275_s23, %s37_s13  }
  0x70   : > { %p46_p10 = por %p45_p13, %p44_p8  ;;  %p1481_p5 = por %p1693_p3, %p44_p8 }
  0x71   : > { %s254_s16 = sand.u32 1, %s1275_s23   ;;  %s841_s17 = sshll.u32 %s1279_s24, 6 }
  0x72   : > { %s1694_s15 = scalar_select %p1481_p5, 1, 0 }
  0x73   : > { %s1487_s12 = sshll.u32 %s254_s16, 2  ;;  %s1492_s19 = scalar_lea.hbm %s1671_s0, %s841_s17 }
  0x74   : > { %s258_s20 = scalar_lea.vmem [#allocation2], %s1487_s12  ;;  %p1495_p11 = pnand %p969_p6, %p46_p10 }
  0x75   : > { %s265_s26 = sshll.u32 %s258_s20, 4  ;;  %s1504_s8 = scalar_lea.hbm %s1672_s1, %s841_s17  ;;  %s1499_s26 = int_to_ptr.vmem [resolvable:$true] %s265_s26 }
  0x76   : > { %s255_s13 = scalar_lea.sflag [#allocation3], %s254_s16  ;;  %s1109_s30 = scalar_lea.hbm %s1492_s19, 64 }
  0x77   : > { %p1110_p7 = scmp.ne.s32.totalorder %s1492_s19, %s1109_s30  ;;  %p1111_p9 = pneg %p1495_p11 }
  0x78   : > { %s1114_s2 = scalar_lea.hbm %s1671_s0, 128  ;;  %p1115_p1 = scmp.lt.u32.totalorder %s1492_s19, %s1671_s0 }
  0x79   : > { %p1112_p12 = pnand %p1111_p9, %p1110_p7  ;;  %p1116_p2 = scmp.lt.u32.totalorder %s1114_s2, %s1109_s30 }
  0x7a   : > { %p1118_p8 = scmp.lt.u32.totalorder %s1109_s30, %s1492_s19 }
  0x7b   : > { %p1113_p0 = pneg %p1112_p12  ;;  %p1117_p4 = por %p1116_p2, %p1115_p1 }
  0x7d   : > { %p1119_p13 = por %p1118_p8, %p1117_p4 }
  0x7f   : > { %p1120_p6 = pnand %p1119_p13, %p1113_p0 }
  0x81   : > { %1123 = shalt.err (!%p1120_p6)
}
  0x82   : > { %s1124_s16 = scalar_lea.vmem %s1499_s26, 64  ;;  %s1286_s17 = smov [#allocation2]  }
  0x83   : > { %p1125_p10 = scmp.ne.s32.totalorder %s1499_s26, %s1124_s16  ;;  %s1129_s10 = sshll.u32 %s1286_s17, 4  ;;  %s1130_s10 = int_to_ptr.vmem [resolvable:$false] %s1129_s10 }
  0x84   : > { %s1131_s3 = scalar_lea.vmem %s1130_s10, 128  ;;  %p1132_p12 = scmp.lt.s32.totalorder %s1499_s26, %s1130_s10 }
  0x85   : > { %p1127_p3 = pnand %p1125_p10, %p1111_p9  ;;  %p1133_p1 = scmp.lt.s32.totalorder %s1131_s3, %s1124_s16 }
  0x87   : > { %p1128_p7 = pneg %p1127_p3  ;;  %p1134_p2 = por %p1133_p1, %p1132_p12 }
  0x89   : > { %p1135_p4 = pnand %p1134_p2, %p1128_p7 }
  0x8b   : > { %1138 = shalt.err (!%p1135_p4)
}
  0x8c   : > { %955 = dma.hbm_to_vmem [thread:$0]  (!%p1495_p11), %s1492_s19, 64, %s1499_s26, %s255_s13  }
  0x8d   : > { %s272_s2 = sand.u32 1, %s1279_s24   ;;  %s276_s4 = scalar_lea.vmem [#allocation5], %s1487_s12 }
  0x8e   : > { %s283_s11 = sshll.u32 %s276_s4, 4  ;;  %s273_s30 = scalar_lea.sflag [#allocation6], %s272_s2  ;;  %s284_s11 = int_to_ptr.vmem [resolvable:$true] %s283_s11 }
  0x8f   : > { %s1139_s9 = scalar_lea.hbm %s1504_s8, 64  ;;  %s1144_s17 = scalar_lea.hbm %s1672_s1, 128 }
  0x90   : > { %p1140_p0 = scmp.ne.s32.totalorder %s1504_s8, %s1139_s9  ;;  %p1145_p6 = scmp.lt.u32.totalorder %s1504_s8, %s1672_s1 }
  0x91   : > { %p1146_p10 = scmp.lt.u32.totalorder %s1144_s17, %s1139_s9  ;;  %p1148_p7 = scmp.lt.u32.totalorder %s1139_s9, %s1504_s8 }
  0x92   : > { %p1142_p8 = pnand %p1140_p0, %p1111_p9 }
  0x93   : > { %p1147_p3 = por %p1146_p10, %p1145_p6 }
  0x94   : > { %p1143_p13 = pneg %p1142_p8 }
  0x95   : > { %p1149_p12 = por %p1148_p7, %p1147_p3 }
  0x97   : > { %p1150_p1 = pnand %p1149_p12, %p1143_p13 }
  0x99   : > { %1153 = shalt.err (!%p1150_p1)
}
  0x9a   : > { %s1154_s12 = scalar_lea.vmem %s284_s11, 64  ;;  %s1287_s19 = smov [#allocation5]  }
  0x9b   : > { %p1155_p2 = scmp.ne.s32.totalorder %s284_s11, %s1154_s12  ;;  %s1159_s26 = sshll.u32 %s1287_s19, 4  ;;  %s1160_s26 = int_to_ptr.vmem [resolvable:$false] %s1159_s26 }
  0x9c   : > { %s1161_s13 = scalar_lea.vmem %s1160_s26, 128  ;;  %p1162_p8 = scmp.lt.s32.totalorder %s284_s11, %s1160_s26 }
  0x9d   : > { %p1157_p4 = pnand %p1155_p2, %p1111_p9  ;;  %p1163_p5 = scmp.lt.s32.totalorder %s1161_s13, %s1154_s12 }
  0x9f   : > { %p1158_p0 = pneg %p1157_p4  ;;  %p1164_p6 = por %p1163_p5, %p1162_p8 }
  0xa1   : > { %p1165_p10 = pnand %p1164_p6, %p1158_p0 }
  0xa3   : > { %1168 = shalt.err (!%p1165_p10)
}
  0xa4   : > { %958 = dma.hbm_to_vmem [thread:$0]  (!%p1495_p11), %s1504_s8, 64, %s284_s11, %s273_s30  }
  0xa5   : > { %p1696_p13 = scmp.ne.s32.totalorder %s1687_s29, 0 }
  0xa6   : > { %s1555_s2 = sand.u32 (!%p1696_p13), 1, %s1271_s22   ;;  %p1697_p9 = scmp.ne.s32.totalorder (!%p1696_p13), %s1685_s27, 0 }
  0xa7   : > { %292 = sbr.rel (%p1696_p13) target bundleno = 1393 (0x571), region = 40  ;;  %s845_s4 = sshll.u32 (!%p1696_p13), %s1555_s2, 2 }
  0xa8   : > { %s295_s9 = scalar_lea.sflag (!%p1696_p13), [#allocation3], %s1555_s2  ;;  %s298_s20 = scalar_lea.vmem (!%p1696_p13), [#allocation2], %s845_s4 }
  0xae   : > { %1242 = dma.done.wait (%p1697_p9), %s295_s9, 64  }
  0xaf   : > { %1244 = vsyncadd (%p1697_p9), %s295_s9, 4294967232  ;;  %s303_s7 = sand.u32 1, %s1348_s25   ;;  %s307_s29 = scalar_lea.vmem [#allocation5], %s845_s4 }
  0xb0   : > { %s304_s8 = scalar_lea.sflag [#allocation6], %s303_s7 }
  0xb1   : > { %1246 = dma.done.wait (%p1697_p9), %s304_s8, 64  }
  0xb2   : > { %1248 = vsyncadd (%p1697_p9), %s304_s8, 4294967232  ;;  %p1698_p5 = scmp.eq.s32.totalorder %s1348_s25, 0 }
  0xb4   : > { %1250 = dma.done.wait (%p1698_p5), [#allocation6], 256   ;;  %p1699_p11 = pmov %p1698_p5 }
  0xb5   : > { %p1700_p3 = pmov %p1698_p5 }
  0xb6   : > { %1252 = vsyncadd (%p1699_p11), [#allocation6], 4294967040 }
  0xb7   : > { %1254 = dma.done.wait (%p1700_p3), [#allocation9], 512   ;;  %p1701_p7 = pmov %p1700_p3 }
  0xb8   : > { %v1288_v0 = vmov 0.0   ;;  %vm1289_vm0 = vmmov 0   ;;  %v1013_v1 = vld [vmem:[#allocation7] sm:$0xff]   ;;  %v1014_v2 = vld [vmem:[#allocation7 + $0x8] sm:$0xff]   ;;  %vm385_vm1 = vcmask 261120   ;;  %vm495_vm2 = vcmask 1043456  }
  0xb9   : > { %1256 = vsyncadd (%p1701_p7), [#allocation9], 4294966784  ;;  %882 = vmatprep.subr.bf16.mxu0 %v1288_v0  ;;  %886 = vmatprep.mubr.msk.bf16.mxu0 %vm1289_vm0, %v1288_v0  ;;  %v360_v3 = vld [vmem:[%s307_s29] sm:$0xf]  ;;  %v359_v5 = vld [vmem:[%s298_s20] sm:$0xf] }
  0xba   : > { %890 = vmatprep.subr.bf16.mxu1 %v1288_v0  ;;  %892 = vmatprep.mubr.msk.bf16.mxu1 %vm1289_vm0, %v1288_v0  ;;  %v434_v4 = vsel %vm385_vm1, %v360_v3, 0  ;;  %v496_v6 = vsel %vm495_vm2, %v360_v3, 0  ;;  %v1015_v8 = vld [vmem:[#allocation10] sm:$0xff]   ;;  %v1016_v13 = vld [vmem:[#allocation10 + $0x8] sm:$0xff]   ;;  %vm476_vm3 = vcmask 64512   ;;  %v1017_v24 = vld [vmem:[#allocation8] sm:$0xff]  }
  0xbb   : > { %883 = vmatpush3.bf16.msra.mxu0 %v1013_v1  ;;  %891 = vmatpush3.bf16.xpose.msra.mxu1 %v434_v4  ;;  %v1018_v25 = vld [vmem:[#allocation8 + $0x8] sm:$0xff]   ;;  %s850_s27 = sshll.u32 %s1555_s2, 3  ;;  %s865_s30 = sshll.u32 %s1348_s25, 7 }
  0xbc   : > { %884 = vmatprep.subr.bf16.mxu0 %v1288_v0  ;;  %902 = vmatprep.subr.bf16.mxu1 %v1288_v0  ;;  %s357_s11 = scalar_lea.vmem [#allocation12], %s850_s27  ;;  %s1599_s10 = scalar_lea.hbm %s1677_s6, %s865_s30 }
  0xbd   : > { %s681_s3 = sshll.u32 %s357_s11, 4  ;;  %s655_s12 = scalar_lea.sflag [#allocation13], %s1555_s2  ;;  %s682_s3 = int_to_ptr.vmem [resolvable:$true] %s681_s3 }
  0xbe   : > { %s1169_s19 = scalar_lea.vmem %s682_s3, 128  ;;  %p1702_p1 = scmp.ne.s32.totalorder %s1694_s15, 0 }
  0xbf   : > { %885 = vmatpush3.bf16.msra.mxu0 %v1014_v2  ;;  %p1170_p12 = scmp.ne.s32.totalorder %s682_s3, %s1169_s19  ;;  %s1290_s26 = smov [#allocation12]  }
  0xc0   : > { %896 = vmatprep.subr.bf16.mxu0 %v1288_v0  ;;  %s1173_s13 = sshll.u32 %s1290_s26, 4  ;;  %s1174_s13 = int_to_ptr.vmem [resolvable:$false] %s1173_s13 }
  0xc1   : > { %p1171_p2 = pnand %p1170_p12, %p1702_p1  ;;  %s1175_s4 = scalar_lea.vmem %s1174_s13, 256 }
  0xc2   : > { %887 = vmatmul.mubr.msk.bf16.vlgmr.msra.gmra.mrb[0].mxu0 %vm385_vm1, %v359_v5  ;;  %p1176_p0 = scmp.lt.s32.totalorder %s682_s3, %s1174_s13  ;;  %p1177_p8 = scmp.lt.s32.totalorder %s1175_s4, %s1169_s19 }
  0xc3   : > { %897 = vmatpush3.bf16.msra.mxu0 %v496_v6  ;;  %898 = vmatprep.mubr.msk.bf16.mxu0 %vm1289_vm0, %v1288_v0  ;;  %p1172_p4 = pneg %p1171_p2 }
  0xc4   : > { %p1178_p6 = por %p1177_p8, %p1176_p0 }
  0xc6   : > { %p1179_p10 = pnand %p1178_p6, %p1172_p4 }
 0x195   : > { %v423_v7 = vpop.f32.mrb[0].mxu0 }
 0x196   : > { %v429_v9 = vpack.c.bf16 %v423_v7, %v423_v7  ;;  %v888_v10 = vpop.f32.mrb[1].mxu0 }
 0x197   : > { %v426_v11 = vpop.f32.mrb[2].mxu0 }
 0x198   : > { %v889_v12 = vpop.f32.mrb[3].mxu0  ;;  %893 = vmatmul.mubr.msk.bf16.vlgmr.msra.gmra.mrb[0].mxu1 %vm385_vm1, %v429_v9 }
 0x199   : > { %903 = vmatpush3.bf16.msra.mxu1 %v1015_v8  ;;  %906 = vmatprep.mubr.msk.bf16.mxu1 %vm1289_vm0, %v1288_v0 }
 0x19a   : > { %904 = vmatprep.subr.bf16.mxu1 %v1288_v0 }
 0x19d   : > { %905 = vmatpush3.bf16.msra.mxu1 %v1016_v13 }
 0x19e   : > { %910 = vmatprep.subr.bf16.mxu1 %v1288_v0 }
 0x1a0   : > { %907 = vmatmul.mubr.msk.bf16.vlgmr.msra.gmra.mrb[4].mxu1 %vm385_vm1, %v429_v9 }
 0x1a1   : > { %914 = vmatprep.mubr.msk.bf16.mxu1 %vm1289_vm0, %v1288_v0  ;;  %911 = vmatpush3.bf16.msra.mxu1 %v1017_v24 }
 0x1a2   : > { %912 = vmatprep.subr.bf16.mxu1 %v1288_v0 }
 0x1a5   : > { %913 = vmatpush3.bf16.msra.mxu1 %v1018_v25 }
 0x26b   : > { %v470_v14 = vpop.f32.mrb[0].mxu1 }
 0x26c   : > { %v894_v15 = vpop.f32.mrb[1].mxu1  ;;  %v477_v16 = vsel %vm476_vm3, %v470_v14, -inf }
 0x26d   : > { %478 = vmax.xlane.f32.xlu0 %v477_v16  ;;  %v473_v17 = vpop.f32.mrb[2].mxu1 }
 0x26e   : > { %v895_v18 = vpop.f32.mrb[3].mxu1 }
 0x2fa   : > { %v479_v19 = vpop.xlane.xlu0 %478 }
 0x2fb   : > { %v480_v20 = vsub.f32 %v470_v14, %v479_v19 }
 0x2fd   : > { %v481_v21 = vmul.f32 1.442695, %v480_v20 }
 0x2ff   : > { %1019 = vpow2.f32 %v481_v21 }
 0x309   : > { %v1020_v22 = vpop.eup %1019 }
 0x30a   : > { %v483_v23 = vsel %vm476_vm3, %v1020_v22, 0.0 }
 0x30b   : > { %484 = vadd.xlane.f32.xlu0 %v483_v23 }
 0x398   : > { %v485_v26 = vpop.xlane.xlu0 %484 }
 0x399   : > { %1021 = vrcp.f32 %v485_v26 }
 0x3a3   : > { %v1022_v27 = vpop.eup %1021 }
 0x3a4   : > { %v487_v28 = vmul.f32 %v1022_v27, %v485_v26 }
 0x3a6   : > { %v488_v29 = vsub.f32 2.0, %v487_v28 }
 0x3a8   : > { %v489_v30 = vmul.f32 %v1022_v27, %v488_v29 }
 0x3aa   : > { %v490_v31 = vmul.f32 %v1020_v22, %v489_v30 }
 0x3ac   : > { %v491_v32 = vpack.c.bf16 %v490_v31, %v490_v31  ;;  %648 = vst.msk [vmem:[%s357_s11] sm:$0xff] %vm476_vm3, %v490_v31 }
 0x3ae   : > { %899 = vmatmul.mubr.msk.bf16.vlgmr.msra.gmra.mrb[4].mxu0 %vm476_vm3, %v491_v32 }
 0x481   : > { %v532_v33 = vpop.f32.mrb[4].mxu0 }
 0x482   : > { %v538_v34 = vpack.c.bf16 %v532_v33, %v532_v33  ;;  %v900_v35 = vpop.f32.mrb[5].mxu0 }
 0x483   : > { %v535_v36 = vpop.f32.mrb[6].mxu0 }
 0x484   : > { %v901_v37 = vpop.f32.mrb[7].mxu0  ;;  %915 = vmatmul.mubr.msk.bf16.vlgmr.msra.gmra.mrb[4].mxu1 %vm385_vm1, %v538_v34 }
 0x485   : > { %1182 = shalt.err (!%p1179_p10)
}
 0x486   : > { %s1183_s9 = scalar_lea.hbm %s1599_s10, 128  ;;  %s1187_s8 = scalar_lea.hbm %s1677_s6, 256 }
 0x487   : > { %p1184_p13 = scmp.ne.s32.totalorder %s1599_s10, %s1183_s9  ;;  %p1188_p11 = scmp.lt.u32.totalorder %s1599_s10, %s1677_s6 }
 0x488   : > { %p1189_p3 = scmp.lt.u32.totalorder %s1187_s8, %s1183_s9  ;;  %p1191_p12 = scmp.lt.u32.totalorder %s1183_s9, %s1599_s10 }
 0x489   : > { %p1185_p9 = pnand %p1184_p13, %p1702_p1 }
 0x48a   : > { %p1190_p7 = por %p1189_p3, %p1188_p11 }
 0x48b   : > { %p1186_p5 = pneg %p1185_p9 }
 0x48c   : > { %p1192_p2 = por %p1191_p12, %p1190_p7 }
 0x48e   : > { %p1193_p4 = pnand %p1192_p2, %p1186_p5 }
 0x490   : > { %1196 = shalt.err (!%p1193_p4)
}
 0x491   : > { %939 = dma.vmem_to_hbm [thread:$0]  (%p1702_p1), %s682_s3, 128, %s1599_s10, %s655_s12  }
 0x492   : > { %s350_s16 = scalar_lea.vmem [#allocation11], %s850_s27  ;;  %s1626_s13 = scalar_lea.hbm %s1676_s5, %s865_s30 }
 0x493   : > { %s668_s17 = sshll.u32 %s350_s16, 4  ;;  %s650_s10 = scalar_lea.sflag [#allocation4], %s1555_s2  ;;  %s1628_s17 = int_to_ptr.vmem [resolvable:$true] %s668_s17 }
 0x494   : > { %s1197_s3 = scalar_lea.vmem %s1628_s17, 128  ;;  %s1291_s25 = smov [#allocation11]  }
 0x495   : > { %p1198_p0 = scmp.ne.s32.totalorder %s1628_s17, %s1197_s3  ;;  %s1201_s27 = sshll.u32 %s1291_s25, 4  ;;  %s1202_s27 = int_to_ptr.vmem [resolvable:$false] %s1201_s27 }
 0x496   : > { %s1203_s12 = scalar_lea.vmem %s1202_s27, 256  ;;  %p1204_p10 = scmp.lt.s32.totalorder %s1628_s17, %s1202_s27 }
 0x497   : > { %p1199_p8 = pnand %p1198_p0, %p1702_p1  ;;  %p1205_p13 = scmp.lt.s32.totalorder %s1203_s12, %s1197_s3 }
 0x499   : > { %p1200_p6 = pneg %p1199_p8  ;;  %p1206_p9 = por %p1205_p13, %p1204_p10 }
 0x49b   : > { %p1207_p5 = pnand %p1206_p9, %p1200_p6 }
 0x557   : > { %v640_v38 = vpop.f32.mrb[4].mxu1 }
 0x558   : > { %1023 = vtanh.f32 %v640_v38  ;;  %v916_v39 = vpop.f32.mrb[5].mxu1 }
 0x559   : > { %v643_v40 = vpop.f32.mrb[6].mxu1 }
 0x55a   : > { %v917_v41 = vpop.f32.mrb[7].mxu1 }
 0x562   : > { %v1024_v42 = vpop.eup %1023 }
 0x563   : > { %647 = vst.msk [vmem:[%s350_s16] sm:$0xff] %vm385_vm1, %v1024_v42 }
 0x564   : > { %1210 = shalt.err (!%p1207_p5)
}
 0x565   : > { %s1211_s2 = scalar_lea.hbm %s1626_s13, 128  ;;  %s1215_s9 = scalar_lea.hbm %s1676_s5, 256 }
 0x566   : > { %p1212_p11 = scmp.ne.s32.totalorder %s1626_s13, %s1211_s2  ;;  %p1216_p12 = scmp.lt.u32.totalorder %s1626_s13, %s1676_s5 }
 0x567   : > { %p1217_p2 = scmp.lt.u32.totalorder %s1215_s9, %s1211_s2  ;;  %p1219_p0 = scmp.lt.u32.totalorder %s1211_s2, %s1626_s13 }
 0x568   : > { %p1213_p3 = pnand %p1212_p11, %p1702_p1 }
 0x569   : > { %p1218_p4 = por %p1217_p2, %p1216_p12 }
 0x56a   : > { %p1214_p7 = pneg %p1213_p3 }
 0x56b   : > { %p1220_p8 = por %p1219_p0, %p1218_p4 }
 0x56d   : > { %p1221_p6 = pnand %p1220_p8, %p1214_p7 }
 0x56f   : > { %1224 = shalt.err (!%p1221_p6)
}
 0x570   : > { %938 = dma.vmem_to_hbm [thread:$0]  (%p1702_p1), %s1628_s17, 128, %s1626_s13, %s650_s10  }
 0x571 PF: > { %s693_s8 = sand.u32 1, %s1267_s21   ;;  %p1703_p10 = scmp.ne.s32.totalorder %s1686_s28, 0 }
 0x572   : > { %p1704_p13 = scmp.ge.s32.totalorder %s1279_s24, 2  ;;  %s694_s29 = scalar_lea.sflag [#allocation4], %s693_s8 }
 0x574   : > { %p960_p9 = pnand %p1704_p13, %p1703_p10 }
 0x576   : > { %1258 = dma.done.wait (!%p960_p9), %s694_s29, 128  }
 0x577   : > { %1260 = vsyncadd (!%p960_p9), %s694_s29, 4294967168  ;;  %s703_s11 = scalar_lea.sflag [#allocation13], %s693_s8 }
 0x578   : > { %1262 = dma.done.wait (!%p960_p9), %s703_s11, 128  }
 0x579   : > { %1264 = vsyncadd (!%p960_p9), %s703_s11, 4294967168  ;;  %p27_p1 = scmp.ge.s32.totalorder %s1467_s18, 4   ;;  %s1705_s21 = smov %s1271_s22 }
 0x57a   : > { %s1706_s22 = smov %s1275_s23  ;;  %s1707_s23 = smov %s1477_s14 }
 0x57b   : > { %s1708_s24 = smov %s1467_s18  ;;  %29 = sbr.rel (!%p27_p1) target bundleno = 14 (0xe), region = 127 }
 0x582   :  { %708 = vsyncpa [#allocation3], 1 }
 0x583   :  { %710 = vsyncpa [#allocation3 + $0x1], 1 }
 0x584   :  { %711 = vsyncpa [#allocation6], 1 }
 0x585   :  { %713 = vsyncpa [#allocation6 + $0x1], 1 }
 0x586   :  { %714 = vsyncpa [#allocation9], 1 }
 0x587   :  { %715 = vsyncpa [#allocation4], 1 }
 0x588   :  { %717 = vsyncpa [#allocation4 + $0x1], 1 }
 0x589   :  { %718 = vsyncpa [#allocation13], 1 }
 0x58a   :  { %720 = vsyncpa [#allocation13 + $0x1], 1 }

</bundles_post_ra>
